<compile_context>
chip_gen: v5e
topology: v5e:2x2
jax: 0.10.0
libtpu: 0.0.40
codegen_flags: <defaults>
</compile_context>

<pallas_src>
import jax
import jax.numpy as jnp
from jax.experimental import pallas as pl
from jax.experimental.pallas import tpu as pltpu

# ----------------------------- configuration -----------------------------
B = 8                              # batch
NUM_DOMAINS = 3
WIDE_EMBED_DIMS = [8, 8]           # per wide feature embed_dim
DEEP_EMBED_DIMS = [16, 16, 16]     # per deep feature embed_dim
WIDE_VOCABS = [11, 13]
DEEP_VOCABS = [17, 19, 23]
D_WIDE = sum(WIDE_EMBED_DIMS)      # 16
D_DEEP = sum(DEEP_EMBED_DIMS)      # 48
D_IN = D_WIDE + D_DEEP             # 64   packed activation width  [deep | wide]
MLP_DIMS = [64, 32]                # mlp_params['dims'];  D_OUT = 32
D_OUT = MLP_DIMS[-1]
K = 8                              # low-rank adapter dim
HYPER_DIMS = [64, 32, K * K]       # hyper_dims + [k*k]
EPS = 1e-5

# ----- packed weight-slab row offsets (lanes always start at 0) -----
_R_W1 = 0       # (64, 128)  rows 0:48 = [wd1 | wh1_deep], rows 48:64 = [0 | wh1_wide]
_R_W2 = 64      # (128, 64)  block-diag(wd2, wh2)
_R_HU = 192     # (64, 128)  lanes 0:64: rows 32:64 = wh3 ; lanes 64:128: rows 0:32 = U0_rep
_R_U1 = 256     # (32, 64)   repeat(u1, K, axis=1)
_R_V0 = 288     # (64, 32)   tile(v0, (K, 1))
_R_V1 = 352     # (64, 32)   tile(v1, (K, 1))
_R_WF = 416     # (32, 1)    wf (final LR on mlp_out)
_R_WW = 448     # (64, 1)    rows 48:64 = w_wide (wide LR on packed activation)
_W_ROWS = 512   # multiple of 8


# ------------------------------- kernel ----------------------------------
def wide_deep_md_adp_kernel(x_ref, dom_ref, w_ref, b_ref, out_ref):
    f32 = jnp.float32
    x = x_ref[...]                                            # (B, 64) = [deep | wide]

    # ---- layer 1: deep-MLP L1 + hyper-net L1 in ONE 128-lane matmul ----
    l1 = jnp.dot(x, w_ref[_R_W1:_R_W1 + 64, :], preferred_element_type=f32)
    l1 = jnp.maximum(l1 + b_ref[0:1, :], 0.0)                 # (B,128) [deep_h | hyper_g1]

    # ---- layer 2 (block-diagonal): [y_deep | hyper_g2] -> (B, 64) ----
    l2 = jnp.dot(l1, w_ref[_R_W2:_R_W2 + 128, 0:64], preferred_element_type=f32)
    l2 = jnp.maximum(l2 + b_ref[1:2, 0:64], 0.0)
    y_deep = l2[:, 0:D_OUT]                                   # (B, 32)

    # ---- hyper layer 3 + adapter-U0 projection share one MXU op ----
    ha = jnp.dot(l2, w_ref[_R_HU:_R_HU + 64, :], preferred_element_type=f32)  # (B,128)
    hyper = jnp.maximum(ha[:, 0:64] + b_ref[2:3, 0:64], 0.0)  # (B, K*K)
    a1 = ha[:, 64:128]                                        # y_deep @ U0_rep

    # ---- adapter layer 1:
    #   einsum('bf,bfj->bj', y_deep, U0 H V0) == ((y_deep @ U0_rep) * hyper) @ V0_tile
    z1 = jnp.dot(a1 * hyper, w_ref[_R_V0:_R_V0 + 64, 0:32],
                 preferred_element_type=f32) + b_ref[3:4, 0:32]
    z1 = jax.nn.sigmoid(z1)                                   # (B, 32)

    # ---- adapter layer 2 ----
    a2 = jnp.dot(z1, w_ref[_R_U1:_R_U1 + 32, 0:64], preferred_element_type=f32)
    z2 = jnp.dot(a2 * hyper, w_ref[_R_V1:_R_V1 + 64, 0:32],
                 preferred_element_type=f32) + b_ref[4:5, 0:32]                # (B, 32)

    # ---- explicit batch norm over dim 0 (torch.var -> unbiased) ----
    nb = z2.shape[0]
    mean = jnp.mean(z2, axis=0, keepdims=True)
    var = jnp.sum((z2 - mean) ** 2, axis=0, keepdims=True) / (nb - 1)
    adapted = b_ref[5:6, 0:32] * (z2 - mean) * jax.lax.rsqrt(var + EPS) + b_ref[6:7, 0:32]

    # ---- residual + final LR + wide LR (both LR biases pre-summed) ----
    mlp_out = adapted + y_deep                                # (B, 32)
    y = jnp.dot(mlp_out, w_ref[_R_WF:_R_WF + 32, 0:1], preferred_element_type=f32)
    y = y + jnp.dot(x, w_ref[_R_WW:_R_WW + 64, 0:1], preferred_element_type=f32)
    y = jax.nn.sigmoid(y + b_ref[7:8, 0:1])                   # (B, 1)

    # ---- domain masking (out_l[d] identical for all d; zero if id out of range) ----
    dom = dom_ref[...]                                        # (B, 1) int32
    valid = jnp.logical_and(dom >= 0, dom < NUM_DOMAINS)
    out_ref[...] = jnp.where(valid, y, jnp.zeros_like(y))


# ------------------------------- wrapper ----------------------------------
def wide_deep_md_adp(input_all, domain_id, w_slab, b_slab):
    vmem = pl.BlockSpec(memory_space=pltpu.MemorySpace.VMEM)
    out = pl.pallas_call(
        wide_deep_md_adp_kernel,
        out_shape=jax.ShapeDtypeStruct((input_all.shape[0], 1), jnp.float32),
        in_specs=[vmem] * 4,
        out_specs=vmem,
    )(input_all, domain_id, w_slab, b_slab)
    return out[:, 0]     # final.squeeze(1)


# --------------------------- parameter set-up ------------------------------
def linear_params(key, fan_in, fan_out):
    kw, kb = jax.random.split(key)
    bound = float(fan_in) ** -0.5
    w = jax.random.uniform(kw, (fan_in, fan_out), jnp.float32, -bound, bound)
    b = jax.random.uniform(kb, (1, fan_out), jnp.float32, -bound, bound)
    return w, b


def fuse_linear_bn_eval(w, b):
    # BatchNorm1d (eval) with default stats: y = (z - 0) / sqrt(1 + eps) * 1 + 0
    s = 1.0 / jnp.sqrt(jnp.float32(1.0) + EPS)
    return w * s, b * s


def build_params(key):
    keys = list(jax.random.split(key, 8))
    # wide LR(wide_dims -> 1)
    w_wide, b_wide = linear_params(keys[0], D_WIDE, 1)
    # deep MLP (Linear + eval-BN fused)
    wd1, bd1 = fuse_linear_bn_eval(*linear_params(keys[1], D_DEEP, MLP_DIMS[0]))
    wd2, bd2 = fuse_linear_bn_eval(*linear_params(keys[2], MLP_DIMS[0], MLP_DIMS[1]))
    # hyper net
    in_dim = D_WIDE + D_DEEP
    wh1, bh1 = fuse_linear_bn_eval(*linear_params(keys[3], in_dim, HYPER_DIMS[0]))
    wh2, bh2 = fuse_linear_bn_eval(*linear_params(keys[4], HYPER_DIMS[0], HYPER_DIMS[1]))
    wh3, bh3 = fuse_linear_bn_eval(*linear_params(keys[5], HYPER_DIMS[1], HYPER_DIMS[2]))
    # adapter params (module __init__ uses ones/zeros; small perturbations added
    # here so the numerical check actually exercises the slab packing)
    ka = list(jax.random.split(keys[7], 8))
    u0 = 1.0 + 0.1 * jax.random.normal(ka[0], (D_OUT, K), jnp.float32)
    u1 = 1.0 + 0.1 * jax.random.normal(ka[1], (32, K), jnp.float32)
    v0 = 1.0 + 0.1 * jax.random.normal(ka[2], (K, 32), jnp.float32)
    v1 = 1.0 + 0.1 * jax.random.normal(ka[3], (K, D_OUT), jnp.float32)
    badp1 = 0.1 * jax.random.normal(ka[4], (1, 32), jnp.float32)
    badp2 = 0.1 * jax.random.normal(ka[5], (1, D_OUT), jnp.float32)
    gamma1 = 1.0 + 0.1 * jax.random.normal(ka[6], (1, D_OUT), jnp.float32)
    bias1 = 0.1 * jax.random.normal(ka[7], (1, D_OUT), jnp.float32)
    # final LR(D_OUT -> 1)
    wf, bf = linear_params(keys[6], D_OUT, 1)
    return [w_wide, b_wide, wd1, bd1, wd2, bd2,
            wh1, bh1, wh2, bh2, wh3, bh3,
            u0, v0, badp1, u1, v1, badp2, gamma1, bias1, wf, bf]


def pack_params(params):
    """Pack the 22 parameter tensors into one weight slab + one bias slab."""
    (w_wide, b_wide, wd1, bd1, wd2, bd2,
     wh1, bh1, wh2, bh2, wh3, bh3,
     u0, v0, badp1, u1, v1, badp2, gamma1, bias1, wf, bf) = params

    W = jnp.zeros((_W_ROWS, 128), jnp.float32)
    # fused layer 1 on packed activation [deep | wide]:
    #   lanes 0:64  -> deep-MLP L1 (deep rows only)
    #   lanes 64:128-> hyper-net L1 (wide rows from wh1[:16], deep rows from wh1[16:])
    W = W.at[_R_W1:_R_W1 + 48, 0:64].set(wd1)
    W = W.at[_R_W1:_R_W1 + 48, 64:128].set(wh1[D_WIDE:])
    W = W.at[_R_W1 + 48:_R_W1 + 64, 64:128].set(wh1[:D_WIDE])
    # fused layer 2: block-diag(wd2, wh2)
    W = W.at[_R_W2:_R_W2 + 64, 0:32].set(wd2)
    W = W.at[_R_W2 + 64:_R_W2 + 128, 32:64].set(wh2)
    # fused (hyper layer 3 | adapter-U0): zero rows kill the unwanted half of l2
    W = W.at[_R_HU + 32:_R_HU + 64, 0:64].set(wh3)
    W = W.at[_R_HU:_R_HU + 32, 64:128].set(jnp.repeat(u0, K, axis=1))
    # adapter:  u replicated K times along columns (u_rep[f, l] = u[f, l//K]),
    #           v tiled K times along rows         (v_tile[l, n] = v[l%K, n])
    W = W.at[_R_U1:_R_U1 + 32, 0:64].set(jnp.repeat(u1, K, axis=1))
    W = W.at[_R_V0:_R_V0 + 64, 0:32].set(jnp.tile(v0, (K, 1)))
    W = W.at[_R_V1:_R_V1 + 64, 0:32].set(jnp.tile(v1, (K, 1)))
    # final LR on mlp_out + wide LR on the packed activation's wide rows
    W = W.at[_R_WF:_R_WF + 32, 0:1].set(wf)
    W = W.at[_R_WW + 48:_R_WW + 64, 0:1].set(w_wide)

    Bp = jnp.zeros((8, 128), jnp.float32)
    Bp = Bp.at[0, 0:64].set(bd1[0]).at[0, 64:128].set(bh1[0])
    Bp = Bp.at[1, 0:32].set(bd2[0]).at[1, 32:64].set(bh2[0])
    Bp = Bp.at[2, 0:64].set(bh3[0])
    Bp = Bp.at[3, 0:32].set(badp1[0])
    Bp = Bp.at[4, 0:32].set(badp2[0])
    Bp = Bp.at[5, 0:32].set(gamma1[0])
    Bp = Bp.at[6, 0:32].set(bias1[0])
    Bp = Bp.at[7, 0].set(b_wide[0, 0] + bf[0, 0])
    return W, Bp


# ---------------------------- pure-JAX reference ---------------------------
def reference_forward(xw, xd, dom, params):
    (w_wide, b_wide, wd1, bd1, wd2, bd2,
     wh1, bh1, wh2, bh2, wh3, bh3,
     u0, v0, badp1, u1, v1, badp2, gamma1, bias1, wf, bf) = params
    relu = lambda z: jnp.maximum(z, 0.0)
    y_wide = xw @ w_wide + b_wide
    y_deep = relu(relu(xd @ wd1 + bd1) @ wd2 + bd2)
    hin = jnp.concatenate([xw, xd], axis=1)
    hyper = relu(relu(relu(hin @ wh1 + bh1) @ wh2 + bh2) @ wh3 + bh3)
    H = hyper.reshape(-1, K, K)
    w1 = jnp.einsum('mi,bij,jn->bmn', u0, H, v0)
    t = jax.nn.sigmoid(jnp.einsum('bf,bfj->bj', y_deep, w1) + badp1)
    w2 = jnp.einsum('mi,bij,jn->bmn', u1, H, v1)
    t = jnp.einsum('bf,bfj->bj', t, w2) + badp2
    mean = t.mean(axis=0, keepdims=True)
    var = jnp.sum((t - mean) ** 2, axis=0, keepdims=True) / (t.shape[0] - 1)
    out = gamma1 * (t - mean) / jnp.sqrt(var + EPS) + bias1
    mlp_out = (out + y_deep) @ wf + bf
    y = jax.nn.sigmoid(y_wide + mlp_out)
    valid = jnp.logical_and(dom >= 0, dom < NUM_DOMAINS)
    return jnp.where(valid, y, 0.0)[:, 0]


# ---------------------------------- main -----------------------------------
if __name__ == "__main__":
    root = jax.random.PRNGKey(0)
    k_emb_w, k_emb_d, k_idx_w, k_idx_d, k_dom, k_par = jax.random.split(root, 6)

    # sparse-id inputs (the `x` dict in the PyTorch module) + embedding tables
    wide_keys = jax.random.split(k_idx_w, len(WIDE_VOCABS))
    deep_keys = jax.random.split(k_idx_d, len(DEEP_VOCABS))
    wide_ids = [jax.random.randint(k, (B,), 0, v).astype(jnp.int32)
                for k, v in zip(wide_keys, WIDE_VOCABS)]
    deep_ids = [jax.random.randint(k, (B,), 0, v).astype(jnp.int32)
                for k, v in zip(deep_keys, DEEP_VOCABS)]
    wide_tab_keys = jax.random.split(k_emb_w, len(WIDE_VOCABS))
    deep_tab_keys = jax.random.split(k_emb_d, len(DEEP_VOCABS))
    wide_tables = [jax.random.normal(k, (v, d), jnp.float32)
                   for k, v, d in zip(wide_tab_keys, WIDE_VOCABS, WIDE_EMBED_DIMS)]
    deep_tables = [jax.random.normal(k, (v, d), jnp.float32)
                   for k, v, d in zip(deep_tab_keys, DEEP_VOCABS, DEEP_EMBED_DIMS)]

    # EmbeddingLayer(..., squeeze_dim=True): lookup + concat (glue)
    input_wide = jnp.concatenate([jnp.take(t, i, axis=0)
                                  for t, i in zip(wide_tables, wide_ids)], axis=1)  # (B, 16)
    input_deep = jnp.concatenate([jnp.take(t, i, axis=0)
                                  for t, i in zip(deep_tables, deep_ids)], axis=1)  # (B, 48)
    domain_id = jax.random.randint(k_dom, (B, 1), 0, NUM_DOMAINS).astype(jnp.int32)

    # pack activations: [deep | wide]  -> one DMA into the kernel
    input_all = jnp.concatenate([input_deep, input_wide], axis=1)                   # (B, 64)

    params = build_params(k_par)
    w_slab, b_slab = pack_params(params)

    out = wide_deep_md_adp(input_all, domain_id, w_slab, b_slab)
    out = jax.block_until_ready(out)

    ref = reference_forward(input_wide, input_deep, domain_id, params)
    assert out.shape == (B,)
    assert bool(jnp.all(jnp.isfinite(out)))
    max_err = float(jnp.max(jnp.abs(out - ref)))
    assert max_err < 5e-3, f"kernel/reference mismatch: {max_err}"
    print("KERNEL_OK")
</pallas_src>

<mosaic_0001>
module attributes {stable_mosaic.version = 11 : i64} {
  func.func @wide_deep_md_adp_kernel(%arg0: memref<8x64xf32, #tpu.memory_space<vmem>>, %arg1: memref<8x1xi32, #tpu.memory_space<vmem>>, %arg2: memref<512x128xf32, #tpu.memory_space<vmem>>, %arg3: memref<8x128xf32, #tpu.memory_space<vmem>>, %arg4: memref<8x1xf32, #tpu.memory_space<vmem>>) attributes {dimension_semantics = [], scalar_prefetch = 0 : i64, scratch_operands = 0 : i64, tpu.core_type = #tpu.core_type<tc>} {
    %c0 = arith.constant 0 : index
    %c0_0 = arith.constant 0 : index
    %0 = vector.load %arg0[%c0, %c0_0] : memref<8x64xf32, #tpu.memory_space<vmem>>, vector<8x64xf32>
    %c0_1 = arith.constant 0 : index
    %c0_2 = arith.constant 0 : index
    %1 = vector.load %arg2[%c0_1, %c0_2] : memref<512x128xf32, #tpu.memory_space<vmem>>, vector<64x128xf32>
    %cst = arith.constant dense<0.000000e+00> : vector<8x128xf32>
    %2 = tpu.matmul %0, %1, %cst {dimension_numbers = #tpu.dot_dimension_numbers<[1], [0], [0], [1], [0, 0, 1, 1], [], []>} : vector<8x64xf32>, vector<64x128xf32>, vector<8x128xf32> -> vector<8x128xf32>
    %c0_3 = arith.constant 0 : index
    %c0_4 = arith.constant 0 : index
    %3 = vector.load %arg3[%c0_3, %c0_4] : memref<8x128xf32, #tpu.memory_space<vmem>>, vector<1x128xf32>
    %4 = vector.broadcast %3 : vector<1x128xf32> to vector<8x128xf32>
    %5 = arith.addf %2, %4 : vector<8x128xf32>
    %cst_5 = arith.constant 0.000000e+00 : f32
    %6 = vector.broadcast %cst_5 : f32 to vector<8x128xf32>
    %7 = arith.maximumf %5, %6 : vector<8x128xf32>
    %c64 = arith.constant 64 : index
    %c0_6 = arith.constant 0 : index
    %8 = vector.load %arg2[%c64, %c0_6] : memref<512x128xf32, #tpu.memory_space<vmem>>, vector<128x64xf32>
    %cst_7 = arith.constant dense<0.000000e+00> : vector<8x64xf32>
    %9 = tpu.matmul %7, %8, %cst_7 {dimension_numbers = #tpu.dot_dimension_numbers<[1], [0], [0], [1], [0, 0, 1, 1], [], []>} : vector<8x128xf32>, vector<128x64xf32>, vector<8x64xf32> -> vector<8x64xf32>
    %c1 = arith.constant 1 : index
    %c0_8 = arith.constant 0 : index
    %10 = vector.load %arg3[%c1, %c0_8] : memref<8x128xf32, #tpu.memory_space<vmem>>, vector<1x64xf32>
    %11 = vector.broadcast %10 : vector<1x64xf32> to vector<8x64xf32>
    %12 = arith.addf %9, %11 : vector<8x64xf32>
    %cst_9 = arith.constant 0.000000e+00 : f32
    %13 = vector.broadcast %cst_9 : f32 to vector<8x64xf32>
    %14 = arith.maximumf %12, %13 : vector<8x64xf32>
    %15 = vector.extract_strided_slice %14 {offsets = [0, 0], sizes = [8, 32], strides = [1, 1]} : vector<8x64xf32> to vector<8x32xf32>
    %c192 = arith.constant 192 : index
    %c0_10 = arith.constant 0 : index
    %16 = vector.load %arg2[%c192, %c0_10] : memref<512x128xf32, #tpu.memory_space<vmem>>, vector<64x128xf32>
    %cst_11 = arith.constant dense<0.000000e+00> : vector<8x128xf32>
    %17 = tpu.matmul %14, %16, %cst_11 {dimension_numbers = #tpu.dot_dimension_numbers<[1], [0], [0], [1], [0, 0, 1, 1], [], []>} : vector<8x64xf32>, vector<64x128xf32>, vector<8x128xf32> -> vector<8x128xf32>
    %18 = vector.extract_strided_slice %17 {offsets = [0, 0], sizes = [8, 64], strides = [1, 1]} : vector<8x128xf32> to vector<8x64xf32>
    %c2 = arith.constant 2 : index
    %c0_12 = arith.constant 0 : index
    %19 = vector.load %arg3[%c2, %c0_12] : memref<8x128xf32, #tpu.memory_space<vmem>>, vector<1x64xf32>
    %20 = vector.broadcast %19 : vector<1x64xf32> to vector<8x64xf32>
    %21 = arith.addf %18, %20 : vector<8x64xf32>
    %cst_13 = arith.constant 0.000000e+00 : f32
    %22 = vector.broadcast %cst_13 : f32 to vector<8x64xf32>
    %23 = arith.maximumf %21, %22 : vector<8x64xf32>
    %24 = vector.extract_strided_slice %17 {offsets = [0, 64], sizes = [8, 64], strides = [1, 1]} : vector<8x128xf32> to vector<8x64xf32>
    %25 = arith.mulf %24, %23 : vector<8x64xf32>
    %c288 = arith.constant 288 : index
    %c0_14 = arith.constant 0 : index
    %26 = vector.load %arg2[%c288, %c0_14] : memref<512x128xf32, #tpu.memory_space<vmem>>, vector<64x32xf32>
    %cst_15 = arith.constant dense<0.000000e+00> : vector<8x32xf32>
    %27 = tpu.matmul %25, %26, %cst_15 {dimension_numbers = #tpu.dot_dimension_numbers<[1], [0], [0], [1], [0, 0, 1, 1], [], []>} : vector<8x64xf32>, vector<64x32xf32>, vector<8x32xf32> -> vector<8x32xf32>
    %c3 = arith.constant 3 : index
    %c0_16 = arith.constant 0 : index
    %28 = vector.load %arg3[%c3, %c0_16] : memref<8x128xf32, #tpu.memory_space<vmem>>, vector<1x32xf32>
    %29 = vector.broadcast %28 : vector<1x32xf32> to vector<8x32xf32>
    %30 = arith.addf %27, %29 : vector<8x32xf32>
    %31 = arith.negf %30 : vector<8x32xf32>
    %32 = math.exp %31 : vector<8x32xf32>
    %cst_17 = arith.constant 1.000000e+00 : f32
    %33 = vector.broadcast %cst_17 : f32 to vector<8x32xf32>
    %34 = arith.addf %33, %32 : vector<8x32xf32>
    %35 = arith.divf %33, %34 : vector<8x32xf32>
    %c256 = arith.constant 256 : index
    %c0_18 = arith.constant 0 : index
    %36 = vector.load %arg2[%c256, %c0_18] : memref<512x128xf32, #tpu.memory_space<vmem>>, vector<32x64xf32>
    %cst_19 = arith.constant dense<0.000000e+00> : vector<8x64xf32>
    %37 = tpu.matmul %35, %36, %cst_19 {dimension_numbers = #tpu.dot_dimension_numbers<[1], [0], [0], [1], [0, 0, 1, 1], [], []>} : vector<8x32xf32>, vector<32x64xf32>, vector<8x64xf32> -> vector<8x64xf32>
    %38 = arith.mulf %37, %23 : vector<8x64xf32>
    %c352 = arith.constant 352 : index
    %c0_20 = arith.constant 0 : index
    %39 = vector.load %arg2[%c352, %c0_20] : memref<512x128xf32, #tpu.memory_space<vmem>>, vector<64x32xf32>
    %cst_21 = arith.constant dense<0.000000e+00> : vector<8x32xf32>
    %40 = tpu.matmul %38, %39, %cst_21 {dimension_numbers = #tpu.dot_dimension_numbers<[1], [0], [0], [1], [0, 0, 1, 1], [], []>} : vector<8x64xf32>, vector<64x32xf32>, vector<8x32xf32> -> vector<8x32xf32>
    %c4 = arith.constant 4 : index
    %c0_22 = arith.constant 0 : index
    %41 = vector.load %arg3[%c4, %c0_22] : memref<8x128xf32, #tpu.memory_space<vmem>>, vector<1x32xf32>
    %42 = vector.broadcast %41 : vector<1x32xf32> to vector<8x32xf32>
    %43 = arith.addf %40, %42 : vector<8x32xf32>
    %cst_23 = arith.constant dense<0.000000e+00> : vector<32xf32>
    %44 = vector.multi_reduction <add>, %43, %cst_23 [0] : vector<8x32xf32> to vector<32xf32>
    %45 = vector.shape_cast %44 : vector<32xf32> to vector<1x32xf32>
    %cst_24 = arith.constant 8.000000e+00 : f32
    %46 = vector.broadcast %cst_24 : f32 to vector<1x32xf32>
    %47 = arith.divf %45, %46 : vector<1x32xf32>
    %48 = vector.broadcast %47 : vector<1x32xf32> to vector<8x32xf32>
    %49 = arith.subf %43, %48 : vector<8x32xf32>
    %50 = arith.mulf %49, %49 : vector<8x32xf32>
    %cst_25 = arith.constant dense<0.000000e+00> : vector<32xf32>
    %51 = vector.multi_reduction <add>, %50, %cst_25 [0] : vector<8x32xf32> to vector<32xf32>
    %52 = vector.shape_cast %51 : vector<32xf32> to vector<1x32xf32>
    %cst_26 = arith.constant 7.000000e+00 : f32
    %53 = vector.broadcast %cst_26 : f32 to vector<1x32xf32>
    %54 = arith.divf %52, %53 : vector<1x32xf32>
    %c5 = arith.constant 5 : index
    %c0_27 = arith.constant 0 : index
    %55 = vector.load %arg3[%c5, %c0_27] : memref<8x128xf32, #tpu.memory_space<vmem>>, vector<1x32xf32>
    %56 = vector.broadcast %47 : vector<1x32xf32> to vector<8x32xf32>
    %57 = arith.subf %43, %56 : vector<8x32xf32>
    %58 = vector.broadcast %55 : vector<1x32xf32> to vector<8x32xf32>
    %59 = arith.mulf %58, %57 : vector<8x32xf32>
    %cst_28 = arith.constant 9.99999974E-6 : f32
    %60 = vector.broadcast %cst_28 : f32 to vector<1x32xf32>
    %61 = arith.addf %54, %60 : vector<1x32xf32>
    %62 = math.rsqrt %61 : vector<1x32xf32>
    %63 = vector.broadcast %62 : vector<1x32xf32> to vector<8x32xf32>
    %64 = arith.mulf %59, %63 : vector<8x32xf32>
    %c6 = arith.constant 6 : index
    %c0_29 = arith.constant 0 : index
    %65 = vector.load %arg3[%c6, %c0_29] : memref<8x128xf32, #tpu.memory_space<vmem>>, vector<1x32xf32>
    %66 = vector.broadcast %65 : vector<1x32xf32> to vector<8x32xf32>
    %67 = arith.addf %64, %66 : vector<8x32xf32>
    %68 = arith.addf %67, %15 : vector<8x32xf32>
    %c416 = arith.constant 416 : index
    %c0_30 = arith.constant 0 : index
    %69 = vector.load %arg2[%c416, %c0_30] : memref<512x128xf32, #tpu.memory_space<vmem>>, vector<32x1xf32>
    %cst_31 = arith.constant dense<0.000000e+00> : vector<8x1xf32>
    %70 = tpu.matmul %68, %69, %cst_31 {dimension_numbers = #tpu.dot_dimension_numbers<[1], [0], [0], [1], [0, 0, 1, 1], [], []>} : vector<8x32xf32>, vector<32x1xf32>, vector<8x1xf32> -> vector<8x1xf32>
    %c448 = arith.constant 448 : index
    %c0_32 = arith.constant 0 : index
    %71 = vector.load %arg2[%c448, %c0_32] : memref<512x128xf32, #tpu.memory_space<vmem>>, vector<64x1xf32>
    %cst_33 = arith.constant dense<0.000000e+00> : vector<8x1xf32>
    %72 = tpu.matmul %0, %71, %cst_33 {dimension_numbers = #tpu.dot_dimension_numbers<[1], [0], [0], [1], [0, 0, 1, 1], [], []>} : vector<8x64xf32>, vector<64x1xf32>, vector<8x1xf32> -> vector<8x1xf32>
    %73 = arith.addf %70, %72 : vector<8x1xf32>
    %c7 = arith.constant 7 : index
    %c0_34 = arith.constant 0 : index
    %74 = vector.load %arg3[%c7, %c0_34] : memref<8x128xf32, #tpu.memory_space<vmem>>, vector<1x1xf32>
    %75 = vector.broadcast %74 : vector<1x1xf32> to vector<8x1xf32>
    %76 = arith.addf %73, %75 : vector<8x1xf32>
    %77 = arith.negf %76 : vector<8x1xf32>
    %78 = math.exp %77 : vector<8x1xf32>
    %cst_35 = arith.constant 1.000000e+00 : f32
    %79 = vector.broadcast %cst_35 : f32 to vector<8x1xf32>
    %80 = arith.addf %79, %78 : vector<8x1xf32>
    %81 = arith.divf %79, %80 : vector<8x1xf32>
    %c0_36 = arith.constant 0 : index
    %c0_37 = arith.constant 0 : index
    %82 = vector.load %arg1[%c0_36, %c0_37] : memref<8x1xi32, #tpu.memory_space<vmem>>, vector<8x1xi32>
    %c0_i32 = arith.constant 0 : i32
    %83 = vector.broadcast %c0_i32 : i32 to vector<8x1xi32>
    %84 = arith.cmpi sge, %82, %83 : vector<8x1xi32>
    %c3_i32 = arith.constant 3 : i32
    %85 = vector.broadcast %c3_i32 : i32 to vector<8x1xi32>
    %86 = arith.cmpi slt, %82, %85 : vector<8x1xi32>
    %87 = arith.andi %84, %86 : vector<8x1xi1>
    %cst_38 = arith.constant 0.000000e+00 : f32
    %88 = vector.broadcast %cst_38 : f32 to vector<8x1xf32>
    %89 = arith.select %87, %81, %88 : vector<8x1xi1>, vector<8x1xf32>
    %c0_39 = arith.constant 0 : index
    %c0_40 = arith.constant 0 : index
    %90 = vector.load %arg4[%c0_39, %c0_40] : memref<8x1xf32, #tpu.memory_space<vmem>>, vector<8x1xf32>
    tpu.vector_store %arg4[%c0_39, %c0_40], %89 {strides = array<i32>} : memref<8x1xf32, #tpu.memory_space<vmem>>, vector<8x1xf32>,
    return
  }
}

</mosaic_0001>

<bundles_post_ra>
// kernel: tpu_custom_call.1
= control target key start
LH: loop header
LB: loop body
LE: loop exit
PB: predicated region body
PF: predicated region fallthrough
CT: control target
= control target key end

     0   :  { %9 = vsyncpa [#allocation3], 0  ;;  %s583_s0 = inlined_call_operand.vmem [shape: f32[8,64], index: 0, kind: input, shape index: {}]   ;;  %s584_s1 = inlined_call_operand.vmem [shape: s32[8,1], index: 1, kind: input, shape index: {}]   ;;  %s585_s2 = inlined_call_operand.hbm [shape: f32[512,128], index: 2, kind: input, shape index: {}]   ;;  %s586_s3 = inlined_call_operand.hbm [shape: f32[8,128], index: 3, kind: input, shape index: {}]   ;;  %s587_s4 = inlined_call_operand.vmem [shape: f32[8,1], index: 4, kind: output, shape index: {}]  }
   0x1   :  { %s19_s17 = sshll.u32 %s585_s2, 4  ;;  %s20_s17 = int_to_ptr.hbm [resolvable:$true] %s19_s17 }
   0x2   :  { %10 = vsyncpa [#allocation5], 0  ;;  %s509_s18 = smov [#allocation2]   ;;  %s33_s22 = sshll.u32 %s586_s3, 4  ;;  %s34_s22 = int_to_ptr.hbm [resolvable:$true] %s33_s22 }
   0x3   :  { %s21_s19 = sshll.u32 %s509_s18, 4  ;;  %s510_s23 = smov 128   ;;  %s22_s19 = int_to_ptr.vmem [resolvable:$true] %s21_s19 }
   0x4   :  { %s511_s24 = smov 8   ;;  %s512_s25 = smov [#allocation4]  }
   0x5   :  { %27 = dma.hbm_to_vmem [thread:$0]  %s20_s17, 8192, %s22_s19, [#allocation3], %s510_s23, %s510_s23, %s511_s24  }
   0x6   :  { %s35_s26 = sshll.u32 %s512_s25, 4  ;;  %s36_s26 = int_to_ptr.vmem [resolvable:$true] %s35_s26 }
   0x7   :  { %38 = dma.hbm_to_vmem [thread:$0]  %s34_s22, 128, %s36_s26, [#allocation5]  }
   0x8   :  { %505 = dma.done.wait [#allocation3], 8192  }
   0x9   :  { %506 = vsyncadd [#allocation3], 4294959104 }
   0xa   :  { %507 = dma.done.wait [#allocation5], 128  }
   0xb   :  { %508 = vsyncadd [#allocation5], 4294967168  ;;  %v55_v0 = vld [vmem:[#allocation2 + $0x38] sm:$0xff]  ;;  %v54_v1 = vld [vmem:[#allocation2 + $0x30] sm:$0xff]  ;;  %vm58_vm0 = vcmask 523264   ;;  %vm220_vm4 = vcmask 261120  }
   0xc   :  { %70 = vmatpush.msra.mxu0 %v55_v0  ;;  %v53_v2 = vld [vmem:[#allocation2 + $0x28] sm:$0xff]  ;;  %v98_v3 = vld [vmem:[#allocation2 + $0xb8] sm:$0xff]  ;;  %v97_v4 = vld [vmem:[#allocation2 + $0xb0] sm:$0xff] }
   0xd   :  { %v52_v5 = vld [vmem:[#allocation2 + $0x20] sm:$0xff]  ;;  %101 = vmatpush.msra.mxu1 %v98_v3  ;;  %v96_v6 = vld [vmem:[#allocation2 + $0xa8] sm:$0xff]  ;;  %v51_v7 = vld [vmem:[#allocation2 + $0x18] sm:$0xff] }
   0xe   :  { %71 = vmatpush.msra.mxu0 %v54_v1  ;;  %v50_v8 = vld [vmem:[#allocation2 + $0x10] sm:$0xff]  ;;  %v95_v9 = vld [vmem:[#allocation2 + $0xa0] sm:$0xff]  ;;  %v94_v10 = vld [vmem:[#allocation2 + $0x98] sm:$0xff] }
   0xf   :  { %102 = vmatpush.msra.mxu1 %v97_v4  ;;  %v49_v11 = vld [vmem:[#allocation2 + $0x8] sm:$0xff]  ;;  %v93_v12 = vld [vmem:[#allocation2 + $0x90] sm:$0xff]  ;;  %v48_v13 = vld [vmem:[#allocation2] sm:$0xff] }
  0x10   :  { %72 = vmatpush.msra.mxu0 %v53_v2  ;;  %v550_v14 = vld [vmem:[%s583_s0] sm:$0xff]  ;;  %v92_v15 = vld [vmem:[#allocation2 + $0x88] sm:$0xff]  ;;  %v90_v17 = vld [vmem:[#allocation2 + $0x78] sm:$0xff]  ;;  %s513_s0 = smov 64  }
  0x11   :  { %103 = vmatpush.msra.mxu1 %v96_v6  ;;  %v91_v16 = vld [vmem:[#allocation2 + $0x80] sm:$0xff]  ;;  %v89_v18 = vld [vmem:[#allocation2 + $0x70] sm:$0xff]  ;;  %v88_v19 = vld [vmem:[#allocation2 + $0x68] sm:$0xff] }
  0x12   :  { %73 = vmatpush.msra.mxu0 %v52_v5  ;;  %v87_v20 = vld [vmem:[#allocation2 + $0x60] sm:$0xff]  ;;  %v86_v21 = vld [vmem:[#allocation2 + $0x58] sm:$0xff]  ;;  %v85_v22 = vld [vmem:[#allocation2 + $0x50] sm:$0xff] }
  0x13   :  { %104 = vmatpush.msra.mxu1 %v95_v9  ;;  %v84_v23 = vld [vmem:[#allocation2 + $0x48] sm:$0xff]  ;;  %v83_v24 = vld [vmem:[#allocation2 + $0x40] sm:$0xff]  ;;  %v129_v25 = vld [vmem:[#allocation2 + $0xf8] sm:$0xff] }
  0x14   :  { %74 = vmatpush.msra.mxu0 %v51_v7  ;;  %v128_v26 = vld [vmem:[#allocation2 + $0xf0] sm:$0xff]  ;;  %141 = vmatpush.msra.mxu2 %v129_v25  ;;  %v127_v27 = vld [vmem:[#allocation2 + $0xe8] sm:$0xff]  ;;  %v126_v28 = vld [vmem:[#allocation2 + $0xe0] sm:$0xff] }
  0x15   :  { %105 = vmatpush.msra.mxu1 %v94_v10  ;;  %v125_v29 = vld [vmem:[#allocation2 + $0xd8] sm:$0xff]  ;;  %v435_v30 = vld [vmem:[#allocation4] ss:$0 sm:$0xff]  ;;  %v124_v34 = vld [vmem:[#allocation2 + $0xd0] sm:$0xff] }
  0x16   :  { %75 = vmatpush.msra.mxu0 %v50_v8  ;;  %142 = vmatpush.msra.mxu2 %v128_v26  ;;  %v123_v35 = vld [vmem:[#allocation2 + $0xc8] sm:$0xff]  ;;  %v122_v36 = vld [vmem:[#allocation2 + $0xc0] sm:$0xff]  ;;  %v169_v45 = vld [vmem:[#allocation2 + $0x158] sm:$0xff] }
  0x17   :  { %106 = vmatpush.msra.mxu1 %v93_v12  ;;  %v436_v37 = vld [vmem:[#allocation4 + $0x1] ss:$0 sm:$0xff]  ;;  %v437_v41 = vld [vmem:[#allocation4 + $0x2] ss:$0 sm:$0xff]  ;;  %v168_v46 = vld [vmem:[#allocation2 + $0x150] sm:$0xff]  ;;  %185 = vmatpush.msra.mxu3 %v169_v45 }
  0x18   :  { %76 = vmatpush.msra.mxu0 %v49_v11  ;;  %143 = vmatpush.msra.mxu2 %v127_v27  ;;  %v167_v47 = vld [vmem:[#allocation2 + $0x148] sm:$0xff]  ;;  %v166_v48 = vld [vmem:[#allocation2 + $0x140] sm:$0xff]  ;;  %v165_v49 = vld [vmem:[#allocation2 + $0x138] sm:$0xff] }
  0x19   :  { %107 = vmatpush.msra.mxu1 %v92_v15  ;;  %186 = vmatpush.msra.mxu3 %v168_v46  ;;  %v164_v50 = vld [vmem:[#allocation2 + $0x130] sm:$0xff]  ;;  %v163_v51 = vld [vmem:[#allocation2 + $0x128] sm:$0xff]  ;;  %v162_v52 = vld [vmem:[#allocation2 + $0x120] sm:$0xff] }
  0x1a   :  { %77 = vmatpush.msra.mxu0 %v48_v13  ;;  %144 = vmatpush.msra.mxu2 %v126_v28  ;;  %v219_v56 = vld [vmem:[#allocation2 + $0x118] sm:$0xff]  ;;  %v218_v57 = vld [vmem:[#allocation2 + $0x110] sm:$0xff]  ;;  %v217_v58 = vld [vmem:[#allocation2 + $0x108] sm:$0xff] }
  0x1b   :  { %419 = vmatmul.msk.f32.vlgmr.msra.gmra.mxu0 %vm58_vm0, %v550_v14  ;;  %108 = vmatpush.msra.mxu1 %v91_v16  ;;  %v216_v59 = vld [vmem:[#allocation2 + $0x100] sm:$0xff]  ;;  %v252_v61 = vld [vmem:[#allocation2 + $0x198] sm:$0xff]  ;;  %v251_v62 = vld [vmem:[#allocation2 + $0x190] sm:$0xff] }
  0x1c   :  { %145 = vmatpush.msra.mxu2 %v125_v29  ;;  %187 = vmatpush.msra.mxu3 %v167_v47  ;;  %v438_v60 = vld [vmem:[#allocation4 + $0x3] ss:$0 sm:$0xff]  ;;  %v250_v1 = vld [vmem:[#allocation2 + $0x188] sm:$0xff]  ;;  %v248_v4 = vld [vmem:[#allocation2 + $0x178] sm:$0xff] }
  0x1d   :  { %109 = vmatpush.msra.mxu1 %v90_v17  ;;  %236 = vmatpush.msrb.mxu0 %v219_v56  ;;  %v249_v3 = vld [vmem:[#allocation2 + $0x180] sm:$0xff]  ;;  %v247_v5 = vld [vmem:[#allocation2 + $0x170] sm:$0xff]  ;;  %v338_v45 = vld [vmem:[#allocation2 + $0x1e8] sm:$0xff] }
  0x1e   :  { %146 = vmatpush.msra.mxu2 %v124_v34  ;;  %188 = vmatpush.msra.mxu3 %v166_v48  ;;  %v439_v25 = vld [vmem:[#allocation4 + $0x4] ss:$0 sm:$0xff]  ;;  %v515_v34 = vmov 7.0  }
  0x1f   :  { %110 = vmatpush.msra.mxu1 %v89_v18  ;;  %237 = vmatpush.msrb.mxu0 %v218_v57  ;;  %v337_v47 = vld [vmem:[#allocation2 + $0x1e0] sm:$0xff] }
  0x20   :  { %147 = vmatpush.msra.mxu2 %v123_v35  ;;  %189 = vmatpush.msra.mxu3 %v165_v49 }
  0x21   :  { %111 = vmatpush.msra.mxu1 %v88_v19  ;;  %238 = vmatpush.msrb.mxu0 %v217_v58  ;;  %v246_v19 = vld [vmem:[#allocation2 + $0x168] sm:$0xff]  ;;  %v332_v58 = vld [vmem:[#allocation2 + $0x1b8] sm:$0xff] }
  0x22   :  { %148 = vmatpush.msra.mxu2 %v122_v36  ;;  %190 = vmatpush.msra.mxu3 %v164_v50  ;;  %v336_v50 = vld [vmem:[#allocation2 + $0x1d8] sm:$0xff] }
  0x23   :  { %112 = vmatpush.msra.mxu1 %v87_v20  ;;  %239 = vmatpush.msrb.mxu0 %v216_v59  ;;  %v245_v20 = vld [vmem:[#allocation2 + $0x160] sm:$0xff] }
  0x24   :  { %191 = vmatpush.msra.mxu3 %v163_v51  ;;  %266 = vmatpush.msrb.mxu2 %v252_v61  ;;  %v333_v59 = vld [vmem:[#allocation2 + $0x1c0] sm:$0xff] }
  0x25   :  { %113 = vmatpush.msra.mxu1 %v86_v21  ;;  %376 = vmatpush.msra.mxu0 %v332_v58 }
  0x26   :  { %192 = vmatpush.msra.mxu3 %v162_v52  ;;  %267 = vmatpush.msrb.mxu2 %v251_v62  ;;  %v335_v52 = vld [vmem:[#allocation2 + $0x1d0] sm:$0xff] }
  0x27   :  { %114 = vmatpush.msra.mxu1 %v85_v22  ;;  %v331_v62 = vld [vmem:[#allocation2 + $0x1b0] sm:$0xff] }
  0x28   :  { %268 = vmatpush.msrb.mxu2 %v250_v1  ;;  %377 = vmatpush.msra.mxu0 %v331_v62 }
  0x29   :  { %115 = vmatpush.msra.mxu1 %v84_v23  ;;  %v514_v23 = vmov 8.0  }
  0x2a   :  { %269 = vmatpush.msrb.mxu2 %v249_v3  ;;  %v329_v3 = vld [vmem:[#allocation2 + $0x1a0] sm:$0xff] }
  0x2b   :  { %116 = vmatpush.msra.mxu1 %v83_v24 }
  0x2c   :  { %270 = vmatpush.msrb.mxu2 %v248_v4 }
  0x2e   :  { %271 = vmatpush.msrb.mxu2 %v247_v5 }
  0x30   :  { %272 = vmatpush.msrb.mxu2 %v246_v19 }
  0x32   :  { %273 = vmatpush.msrb.mxu2 %v245_v20 }
  0x98   :  { %v79_v31 = vpop.f32.mrf.mxu0 }
  0x99   :  { %v80_v32 = vadd.f32 %v435_v30, %v79_v31 }
  0x9b   :  { %v82_v33 = vmax.f32 %v80_v32, 0.0 }
  0x9d   :  { %117 = vmatmul.f32.vlgmr.msra.gmra.mxu1 %v82_v33 }
 0x11a   :  { %v118_v38 = vpop.f32.mrf.mxu1 }
 0x11b   :  { %v554_v39 = vadd.f32 %v436_v37, %v118_v38  ;;  %v340_v37 = vld [vmem:[#allocation2 + $0x1f8] sm:$0xff] }
 0x11c   :  { %349 = vmatpush.msrb.mxu3 %v340_v37 }
 0x11d   :  { %v121_v40 = vmax.f32 %v554_v39, 0.0 }
 0x11f   :  { %420 = vmatmul.msk.f32.vlgmr.msra.gmra.mxu2 %vm58_vm0, %v121_v40 }
 0x1a2   :  { %v150_v42 = vpop.f32.mrf.mxu2 }
 0x1a3   :  { %v560_v43 = vadd.f32 %v437_v41, %v150_v42  ;;  %v339_v41 = vld [vmem:[#allocation2 + $0x1f0] sm:$0xff] }
 0x1a4   :  { %350 = vmatpush.msrb.mxu3 %v339_v41 }
 0x1a5   :  { %v156_v44 = vmax.f32 %v560_v43, 0.0 }
 0x1a6   :  { %351 = vmatpush.msrb.mxu3 %v338_v45 }
 0x1a7   :  { %158 = vrot.lane.b32.xlu0 %v156_v44, %s513_s0 }
 0x1a8   :  { %352 = vmatpush.msrb.mxu3 %v337_v47 }
 0x1aa   :  { %353 = vmatpush.msrb.mxu3 %v336_v50 }
 0x1ac   :  { %354 = vmatpush.msrb.mxu3 %v335_v52 }
 0x219   :  { %v159_v53 = vpop.permute.xlu0 %158 }
 0x21a   :  { %v161_v54 = vmul.f32 %v159_v53, %v150_v42 }
 0x21c   :  { %173 = vrot.lane.b32.xlu0 %v161_v54, %s513_s0 }
 0x28e   :  { %v174_v55 = vpop.permute.xlu0 %173 }
 0x28f   :  { %421 = vmatmul.msk.f32.vlgmr.msra.gmra.mxu3 %vm58_vm0, %v174_v55  ;;  %v334_v55 = vld [vmem:[#allocation2 + $0x1c8] sm:$0xff] }
 0x290   :  { %355 = vmatpush.msrb.mxu3 %v334_v55 }
 0x292   :  { %356 = vmatpush.msrb.mxu3 %v333_v59 }
 0x297   :  { %425 = vmatmul.msk.f32.vlgmr.msrb.gmra.mxu3 %vm58_vm0, %v550_v14 }
 0x312   :  { %v194_v63 = vpop.f32.mrf.mxu3 }
 0x313   :  { %v195_v0 = vadd.f32 %v438_v60, %v194_v63 }
 0x315   :  { %v422_v2 = vmul.f32 -1.442695, %v195_v0  ;;  %v330_v0 = vld [vmem:[#allocation2 + $0x1a8] sm:$0xff] }
 0x316   :  { %378 = vmatpush.msra.mxu0 %v330_v0 }
 0x317   :  { %443 = vpow2.f32 %v422_v2 }
 0x318   :  { %379 = vmatpush.msra.mxu0 %v329_v3 }
 0x31d   :  { %v444_v6 = vpop.eup %443 }
 0x31e   :  { %v200_v7 = vadd.f32 1.0, %v444_v6 }
 0x320   :  { %445 = vrcp.f32 %v200_v7  ;;  %v212_v11 = vand.u32 2147483648, %v200_v7  ;;  %v210_v13 = vand.u32 2147483647, %v200_v7  ;;  %vm206_vm2 = vweird.f32 %v200_v7 }
 0x321   :  { %447 = vrcp.f32 %v514_v23  ;;  %v442_v23 = vld [vmem:[#allocation4 + $0x7] ss:$0 sm:$0xff] }
 0x322   :  { %v213_v16 = vor.u32 1.1754944e-38, %v212_v11  ;;  %vm211_vm5 = vcmp.eq.f32.partialorder %v210_v13, 8.507059e+37  ;;  %449 = vrcp.f32 %v515_v34 }
 0x326   :  { %v446_v8 = vpop.eup %445 }
 0x327   :  { %v202_v9 = vmul.f32 %v446_v8, %v200_v7  ;;  %vm207_vm1 = vweird.f32 %v446_v8  ;;  %v448_v24 = vpop.eup %447 }
 0x328   :  { %vm208_vm3 = vmor %vm206_vm2, %vm207_vm1  ;;  %v286_v26 = vmul.f32 8.0, %v448_v24  ;;  %vm290_vm6 = vweird.f32 %v448_v24  ;;  %v450_v43 = vpop.eup %449  ;;  %vm411_vm2 = vcmask 7168  }
 0x329   :  { %v203_v10 = vsub.f32 1.0, %v202_v9  ;;  %v303_v49 = vmul.f32 7.0, %v450_v43  ;;  %vm307_vm7 = vweird.f32 %v450_v43 }
 0x32a   :  { %v287_v29 = vsub.f32 1.0, %v286_v26 }
 0x32b   :  { %v204_v12 = vmul.f32 %v446_v8, %v203_v10  ;;  %v304_v54 = vsub.f32 1.0, %v303_v49 }
 0x32c   :  { %v288_v32 = vmul.f32 %v448_v24, %v287_v29 }
 0x32d   :  { %v205_v15 = vadd.f32 %v446_v8, %v204_v12  ;;  %v305_v60 = vmul.f32 %v450_v43, %v304_v54  ;;  %v440_v12 = vld [vmem:[#allocation4 + $0x5] ss:$0 sm:$0xff] }
 0x32e   :  { %v289_v36 = vadd.f32 %v448_v24, %v288_v32  ;;  %v406_v32 = vld [vmem:[%s584_s1] sm:$0xff] }
 0x32f   :  { %v209_v17 = vsel %vm208_vm3, %v446_v8, %v205_v15  ;;  %v306_v1 = vadd.f32 %v450_v43, %v305_v60  ;;  %vm407_vm11 = vcmp.ge.s32.totalorder %v406_v32, 0  ;;  %vm408_vm12 = vcmp.lt.s32.totalorder %v406_v32, 3 }
 0x330   :  { %v214_v18 = vsel %vm211_vm5, %v213_v16, %v209_v17  ;;  %v441_v17 = vld [vmem:[#allocation4 + $0x6] ss:$0 sm:$0xff]  ;;  %vm409_vm15 = vmand %vm407_vm11, %vm408_vm12 }
 0x331   :  { %423 = vmatmul.msk.f32.vlgmr.msrb.gmra.mxu0 %vm220_vm4, %v214_v18  ;;  %v308_v5 = vsel %vm307_vm7, %v450_v43, %v306_v1 }
 0x3ae   :  { %v241_v21 = vpop.f32.mrf.mxu0 }
 0x3af   :  { %v244_v22 = vmul.f32 %v241_v21, %v156_v44  ;;  %v291_v44 = vsel %vm290_vm6, %v448_v24, %v289_v36 }
 0x3b1   :  { %424 = vmatmul.msk.f32.vlgmr.msrb.gmra.mxu2 %vm58_vm0, %v244_v22  ;;  %v358_v22 = vpop.f32.mrf.mxu3 }
 0x434   :  { %v275_v27 = vpop.f32.mrf.mxu2 }
 0x435   :  { %v276_v28 = vadd.f32 %v439_v25, %v275_v27 }
 0x437   :  { %v278_v30 = vsel %vm220_vm4, %v276_v28, 0.0 }
 0x438   :  { %v279_v31 = vrot.slane %v278_v30, 4 }
 0x43a   :  { %v280_v33 = vadd.f32 %v279_v31, %v278_v30 }
 0x43c   :  { %v281_v35 = vrot.slane %v280_v33, 2 }
 0x43e   :  { %v282_v38 = vadd.f32 %v281_v35, %v280_v33 }
 0x440   :  { %v283_v42 = vrot.slane %v282_v38, 1 }
 0x442   :  { %v284_v46 = vadd.f32 %v283_v42, %v282_v38 }
 0x444   :  { %v292_v48 = vmul.f32 %v291_v44, %v284_v46 }
 0x446   :  { %v293_v51 = vsub.f32 %v276_v28, %v292_v48 }
 0x448   :  { %v294_v53 = vmul.f32 %v293_v51, %v293_v51  ;;  %v312_v16 = vmul.f32 %v440_v12, %v293_v51 }
 0x44a   :  { %v295_v56 = vsel %vm220_vm4, %v294_v53, 0.0 }
 0x44b   :  { %v296_v57 = vrot.slane %v295_v56, 4 }
 0x44d   :  { %v297_v61 = vadd.f32 %v296_v57, %v295_v56 }
 0x44f   :  { %v298_v63 = vrot.slane %v297_v61, 2 }
 0x451   :  { %v299_v2 = vadd.f32 %v298_v63, %v297_v61 }
 0x453   :  { %v300_v4 = vrot.slane %v299_v2, 1 }
 0x455   :  { %v301_v6 = vadd.f32 %v300_v4, %v299_v2 }
 0x457   :  { %v309_v7 = vmul.f32 %v308_v5, %v301_v6 }
 0x459   :  { %v313_v8 = vadd.f32 1e-05, %v309_v7 }
 0x45b   :  { %451 = vrsqrt.f32 %v313_v8  ;;  %vm320_vm9 = vweird.f32 %v313_v8 }
 0x461   :  { %v452_v9 = vpop.eup %451 }
 0x462   :  { %v315_v10 = vmul.f32 %v452_v9, %v313_v8  ;;  %vm321_vm8 = vweird.f32 %v452_v9 }
 0x463   :  { %vm322_vm10 = vmor %vm320_vm9, %vm321_vm8 }
 0x464   :  { %v316_v11 = vmul.f32 %v452_v9, %v315_v10 }
 0x466   :  { %v317_v14 = vmul.f32 0.5, %v316_v11 }
 0x468   :  { %v318_v13 = vsub.f32 1.5, %v317_v14 }
 0x46a   :  { %v319_v15 = vmul.f32 %v452_v9, %v318_v13 }
 0x46c   :  { %v323_v18 = vsel %vm322_vm10, %v452_v9, %v319_v15 }
 0x46d   :  { %v324_v19 = vmul.f32 %v323_v18, %v312_v16 }
 0x46f   :  { %v327_v20 = vadd.f32 %v441_v17, %v324_v19 }
 0x471   :  { %v328_v21 = vadd.f32 %v327_v20, %v121_v40 }
 0x473   :  { %426 = vmatmul.msk.f32.vlgmr.msra.gmra.mxu0 %vm220_vm4, %v328_v21 }
 0x4f0   :  { %v381_v24 = vpop.f32.mrf.mxu0 }
 0x4f1   :  { %v382_v25 = vadd.f32 %v381_v24, %v358_v22 }
 0x4f3   :  { %v386_v26 = vadd.f32 %v442_v23, %v382_v25 }
 0x4f5   :  { %v427_v27 = vmul.f32 -1.442695, %v386_v26 }
 0x4f7   :  { %453 = vpow2.f32 %v427_v27 }
 0x4fd   :  { %v454_v28 = vpop.eup %453 }
 0x4fe   :  { %v390_v29 = vadd.f32 1.0, %v454_v28 }
 0x500   :  { %455 = vrcp.f32 %v390_v29  ;;  %v402_v40 = vand.u32 2147483648, %v390_v29  ;;  %v400_v34 = vand.u32 2147483647, %v390_v29  ;;  %vm396_vm14 = vweird.f32 %v390_v29 }
 0x502   :  { %v403_v36 = vor.u32 1.1754944e-38, %v402_v40  ;;  %vm401_vm1 = vcmp.eq.f32.partialorder %v400_v34, 8.507059e+37 }
 0x506   :  { %v456_v30 = vpop.eup %455 }
 0x507   :  { %v392_v31 = vmul.f32 %v456_v30, %v390_v29  ;;  %vm397_vm13 = vweird.f32 %v456_v30 }
 0x508   :  { %vm398_vm0 = vmor %vm396_vm14, %vm397_vm13 }
 0x509   :  { %v393_v39 = vsub.f32 1.0, %v392_v31 }
 0x50b   :  { %v394_v33 = vmul.f32 %v456_v30, %v393_v39 }
 0x50d   :  { %v395_v35 = vadd.f32 %v456_v30, %v394_v33 }
 0x50f   :  { %v399_v37 = vsel %vm398_vm0, %v456_v30, %v395_v35 }
 0x510   :  { %v404_v38 = vsel %vm401_vm1, %v403_v36, %v399_v37 }
 0x511   :  { %v410_v41 = vsel %vm409_vm15, %v404_v38, 0.0 }
 0x512   :  { %412 = vst.msk [vmem:[%s587_s4] sm:$0xff] %vm411_vm2, %v410_v41 }
 0x513   :  { %417 = vsyncpa [#allocation3], 1 }
 0x514   :  { %418 = vsyncpa [#allocation5], 1 }

</bundles_post_ra>
